<compile_context>
chip_gen: v7x
topology: tpu7x:2x2x1
jax: 0.10.0
libtpu: 0.0.40
codegen_flags: <defaults>
</compile_context>

<pallas_src>
import jax
import jax.numpy as jnp
import numpy as np
from jax import lax
from jax.experimental import pallas as pl
from jax.experimental.pallas import tpu as pltpu


# ---------------------------------------------------------------------------
# Kernel: whole forward pass = 4 VPU FMAs + 5 MXU matmuls + elementwise ops on
# (B_TILE, channel*length) tiles.  All folded weights stay resident in VMEM.
# ---------------------------------------------------------------------------
def _make_kernel(cin):
    def kernel(x_ref, w1_ref, b1_ref, m1_ref, c1_ref, p_ref,
               m2_ref, c2_ref, m3_ref, c3_ref, mf_ref, out_ref):
        f32, bf16 = jnp.float32, jnp.bfloat16

        # dense1 on the VPU (bn1 folded into w1f/b1f; dropout1 = identity).
        h = x_ref[:, 0:1] * w1_ref[0:1, :] + b1_ref[...]
        for k in range(1, cin):                     # static unroll, cin tiny
            h = h + x_ref[:, k:k + 1] * w1_ref[k:k + 1, :]
        # CELU(alpha=1) = max(x, 0) + (exp(min(x, 0)) - 1)
        h = jnp.maximum(h, 0.0) + (jnp.exp(jnp.minimum(h, 0.0)) - 1.0)

        # bn_cv1 + grouped conv1 (k=5, pad=2) as one Toeplitz matmul, ReLU.
        a1 = jnp.dot(h.astype(bf16), m1_ref[...],
                     preferred_element_type=f32) + c1_ref[...]
        a1 = jnp.maximum(a1, 0.0)

        # adaptive average pool s1 -> s2 as one block-diagonal matmul.
        pooled = jnp.dot(a1.astype(bf16), p_ref[...], preferred_element_type=f32)

        # bn_cv2 + conv2 (k=3, pad=1); dropout2d = identity; ReLU; residual.
        h2 = jnp.dot(pooled.astype(bf16), m2_ref[...],
                     preferred_element_type=f32) + c2_ref[...]
        h2 = jnp.maximum(h2, 0.0) + pooled

        # bn_cv3 + conv3 (k=3, pad=1); ReLU.
        h3 = jnp.dot(h2.astype(bf16), m3_ref[...],
                     preferred_element_type=f32) + c3_ref[...]
        h3 = jnp.maximum(h3, 0.0)

        # final_mlp: Linear(s2 -> 1, bias=False) per output channel.
        # Output is embed_dim (<128) lanes -> masked store; bytes are tiny.
        out_ref[...] = jnp.dot(h3.astype(bf16), mf_ref[...],
                               preferred_element_type=f32)
    return kernel


def _round_up(n, m):
    return (n + m - 1) // m * m


def tabular1dcnn_forward(x, folded, *, b_tile=256):
    """x: (B, input_dim). Returns (B, embed_dim)."""
    B, cin = x.shape
    hid = folded['w1f'].shape[1]
    e = folded['Mf'].shape[1]

    # Batch tile: multiple of 8 sublanes, up to 256 rows (fills v6e/v7x MXU).
    bt = min(b_tile, _round_up(B, 8))
    Bp = _round_up(B, bt)
    x = x.astype(jnp.float32)
    if Bp != B:
        x = jnp.pad(x, ((0, Bp - B), (0, 0)))
    grid = (Bp // bt,)

    weights = (folded['w1f'], folded['b1f'], folded['M1'], folded['c1'],
               folded['P'], folded['M2'], folded['c2'], folded['M3'],
               folded['c3'], folded['Mf'])

    def w_spec(a):
        # Constant index_map: weight block fetched once, resident across steps.
        return pl.BlockSpec(a.shape, lambda i: (0, 0))

    # Cost estimate (advisory, helps XLA schedule around the small call).
    ck_s1 = folded['M1'].shape[1]
    ck_s2 = folded['M2'].shape[0]
    e_s2 = folded['M3'].shape[1]
    flops = int(2 * Bp * (cin * hid + hid * ck_s1 + ck_s1 * ck_s2 +
                          ck_s2 * ck_s2 + ck_s2 * e_s2 + e_s2 * e))
    w_bytes = sum(int(a.size) * int(a.dtype.itemsize) for a in weights)
    bytes_accessed = int(Bp * cin * 4 + w_bytes + Bp * e * 4)

    out = pl.pallas_call(
        _make_kernel(cin),
        out_shape=jax.ShapeDtypeStruct((Bp, e), jnp.float32),
        grid=grid,
        in_specs=[pl.BlockSpec((bt, cin), lambda i: (i, 0))]
                 + [w_spec(a) for a in weights],
        out_specs=pl.BlockSpec((bt, e), lambda i: (i, 0)),
        compiler_params=pltpu.CompilerParams(
            dimension_semantics=("parallel",)),
        cost_estimate=pl.CostEstimate(flops=flops,
                                      transcendentals=int(Bp * hid),
                                      bytes_accessed=bytes_accessed),
    )(x, *weights)
    return out[:B]


# ---------------------------------------------------------------------------
# One-time host-side weight preprocessing (model-load-time folding).
# ---------------------------------------------------------------------------
def fold_params(p, *, input_dim, embed_dim, K):
    f32, bf16 = jnp.float32, jnp.bfloat16
    cin = input_dim
    e = embed_dim
    s1, s2 = 2 * e, e
    ck = cin * K
    hid = cin * s1

    # ---- bn1 folded into dense1 ------------------------------------------
    bn1_s = p['bn1_s'].reshape(cin)
    bn1_b = p['bn1_b'].reshape(cin)
    w1 = p['w1']                                            # (cin, hid)
    w1f = w1 * bn1_s[:, None]
    b1f = (bn1_b @ w1).reshape(1, hid)

    # ---- bn_cv1 + grouped conv1 (k=5, pad=2) as (hid, ck*s1) matrix -------
    wdw = p['wdw']                                          # (ck, 5) [o, t]
    s1v = p['bncv1_s'].reshape(cin)
    b1v = p['bncv1_b'].reshape(cin)
    lp = jnp.arange(s1)                                     # input position l'
    lo = jnp.arange(s1)                                     # output position l
    t1 = lp[:, None] - lo[None, :] + 2
    v1 = ((t1 >= 0) & (t1 < 5)).astype(f32)
    tap1 = wdw[:, jnp.clip(t1, 0, 4)] * v1[None]            # (ck, s1, s1) [o,l',l]
    group = jnp.arange(ck) // K
    cmask = (jnp.arange(cin)[:, None] == group[None, :]).astype(f32)   # (cin, ck)
    M1 = (s1v[:, None, None, None] * cmask[:, None, :, None] *
          jnp.transpose(tap1, (1, 0, 2))[None])             # (cin, s1, ck, s1)
    M1 = M1.reshape(hid, ck * s1)
    c1 = (b1v[group][:, None] * tap1.sum(axis=1)).reshape(1, ck * s1)

    # ---- adaptive avg pool s1 -> s2 as block-diag (ck*s1, ck*s2) ----------
    jc = jnp.arange(s2)
    start = (jc * s1) // s2
    end = ((jc + 1) * s1 + s2 - 1) // s2
    lr = jnp.arange(s1)
    win = ((lr[:, None] >= start[None, :]) & (lr[:, None] < end[None, :])).astype(f32)
    pool1 = win / (end - start)[None, :].astype(f32)        # (s1, s2)
    P = (jnp.eye(ck, dtype=f32)[:, None, :, None] *
         pool1[None, :, None, :]).reshape(ck * s1, ck * s2)

    # ---- conv2 / conv3 (k=3, pad=1) with preceding BN folded --------------
    jp = jnp.arange(s2)
    jo = jnp.arange(s2)
    t2 = jp[:, None] - jo[None, :] + 1
    v2 = ((t2 >= 0) & (t2 < 3)).astype(f32)
    t2c = jnp.clip(t2, 0, 2)

    def conv3x_fold(w, scale, bias):
        # w: (3, Cout, Cin) [t, o, i]  ->  (Cin*s2, Cout*s2) matrix + bias row
        taps = w[t2c] * v2[:, :, None, None]                # (s2, s2, Cout, Cin)
        m = jnp.transpose(taps, (3, 0, 2, 1))               # [i, j', o, j]
        m = scale[:, None, None, None] * m
        cout, c_in = w.shape[1], w.shape[2]
        m = m.reshape(c_in * s2, cout * s2)
        c = jnp.einsum('i,pjoi->oj', bias, taps).reshape(1, cout * s2)
        return m, c

    M2, c2 = conv3x_fold(p['w2'], p['bncv2_s'].reshape(ck), p['bncv2_b'].reshape(ck))
    M3, c3 = conv3x_fold(p['w3'], p['bncv3_s'].reshape(ck), p['bncv3_b'].reshape(ck))

    # ---- final linear over the length axis, per output channel ------------
    wf = p['wf'].reshape(s2)                                # s2 == embed_dim
    Mf = (jnp.eye(e, dtype=f32)[:, None, :] * wf[None, :, None]).reshape(e * s2, e)

    # Big matmul operands in bf16 (native MXU path, half the DMA bytes);
    # the VPU-path first layer and all bias rows stay f32.
    return dict(w1f=w1f.astype(f32), b1f=b1f.astype(f32),
                M1=M1.astype(bf16), c1=c1.astype(f32), P=P.astype(bf16),
                M2=M2.astype(bf16), c2=c2.astype(f32),
                M3=M3.astype(bf16), c3=c3.astype(f32), Mf=Mf.astype(bf16))


# ---------------------------------------------------------------------------
# Parameter construction (folded-BN eval-mode params) and pure-JAX reference.
# ---------------------------------------------------------------------------
def init_params(key, input_dim, embed_dim, K):
    hid = input_dim * embed_dim * 2
    cin = input_dim
    ck = cin * K
    e = embed_dim
    eps = 1e-5
    keys = jax.random.split(key, 16)

    def bn_fold(kg, kb, km, kv, n):
        gamma = 1.0 + 0.1 * jax.random.normal(kg, (n,), jnp.float32)
        beta = 0.1 * jax.random.normal(kb, (n,), jnp.float32)
        rmean = 0.1 * jax.random.normal(km, (n,), jnp.float32)
        rvar = jax.random.uniform(kv, (n,), jnp.float32, 0.5, 1.5)
        scale = gamma / jnp.sqrt(rvar + eps)
        bias = beta - rmean * scale
        return scale, bias

    bn1_s, bn1_b = bn_fold(keys[0], keys[1], keys[2], keys[3], input_dim)
    bncv1_s, bncv1_b = bn_fold(keys[4], keys[5], keys[6], keys[7], cin)
    k2 = jax.random.split(keys[8], 8)
    bncv2_s, bncv2_b = bn_fold(k2[0], k2[1], k2[2], k2[3], ck)
    bncv3_s, bncv3_b = bn_fold(k2[4], k2[5], k2[6], k2[7], ck)

    w1 = 0.3 * jax.random.normal(keys[9], (input_dim, hid), jnp.float32)
    wdw = 0.3 * jax.random.normal(keys[10], (ck, 5), jnp.float32)
    w2 = 0.2 * jax.random.normal(keys[11], (3, ck, ck), jnp.float32)
    w3 = 0.2 * jax.random.normal(keys[12], (3, e, ck), jnp.float32)
    wf = 0.3 * jax.random.normal(keys[13], (1, e), jnp.float32)

    return dict(
        bn1_s=bn1_s.reshape(1, input_dim), bn1_b=bn1_b.reshape(1, input_dim),
        bncv1_s=bncv1_s.reshape(cin, 1), bncv1_b=bncv1_b.reshape(cin, 1),
        bncv2_s=bncv2_s.reshape(ck, 1), bncv2_b=bncv2_b.reshape(ck, 1),
        bncv3_s=bncv3_s.reshape(ck, 1), bncv3_b=bncv3_b.reshape(ck, 1),
        w1=w1, wdw=wdw, w2=w2, w3=w3, wf=wf)


def reference_forward(x, p, *, input_dim, embed_dim, K):
    """Pure-JAX reference mirroring the PyTorch forward (eval mode)."""
    B = x.shape[0]
    cin = input_dim
    ck = cin * K
    s1, s2 = 2 * embed_dim, embed_dim
    hp = lax.Precision.HIGHEST

    h = x * p['bn1_s'] + p['bn1_b']
    h = jnp.dot(h, p['w1'], precision=hp)
    h = jnp.where(h > 0, h, jnp.exp(jnp.minimum(h, 0.0)) - 1.0)     # CELU
    h = h.reshape(B, cin, s1)
    h = h * p['bncv1_s'][None] + p['bncv1_b'][None]

    wdw = p['wdw'].reshape(ck, 1, 5)
    c1 = lax.conv_general_dilated(h, wdw, (1,), [(2, 2)],
                                  dimension_numbers=('NCH', 'OIH', 'NCH'),
                                  feature_group_count=cin, precision=hp)
    c1 = jnp.maximum(c1, 0.0)
    pooled = c1.reshape(B, ck, s2, 2).mean(-1)                      # adaptive pool

    x_in = pooled
    h2 = pooled * p['bncv2_s'][None] + p['bncv2_b'][None]
    w2 = jnp.transpose(p['w2'], (1, 2, 0))
    c2 = lax.conv_general_dilated(h2, w2, (1,), [(1, 1)],
                                  dimension_numbers=('NCH', 'OIH', 'NCH'),
                                  precision=hp)
    h2 = jnp.maximum(c2, 0.0) + x_in

    h3 = h2 * p['bncv3_s'][None] + p['bncv3_b'][None]
    w3 = jnp.transpose(p['w3'], (1, 2, 0))
    c3 = lax.conv_general_dilated(h3, w3, (1,), [(1, 1)],
                                  dimension_numbers=('NCH', 'OIH', 'NCH'),
                                  precision=hp)
    h3 = jnp.maximum(c3, 0.0)                                       # (B, e, s2)
    return jnp.einsum('bcj,j->bc', h3, p['wf'][0], precision=hp)


if __name__ == "__main__":
    INPUT_DIM, EMBED_DIM, KK, BATCH = 4, 16, 4, 8
    key = jax.random.PRNGKey(0)
    kx, kp = jax.random.split(key)
    x = jax.random.normal(kx, (BATCH, INPUT_DIM), jnp.float32)
    params = init_params(kp, INPUT_DIM, EMBED_DIM, KK)

    folded = fold_params(params, input_dim=INPUT_DIM, embed_dim=EMBED_DIM, K=KK)
    out = tabular1dcnn_forward(x, folded)
    out = jax.block_until_ready(out)

    ref = reference_forward(x, params, input_dim=INPUT_DIM,
                            embed_dim=EMBED_DIM, K=KK)
    assert out.shape == (BATCH, EMBED_DIM)
    np.testing.assert_allclose(np.asarray(out), np.asarray(ref),
                               rtol=2e-2, atol=2e-2)
    print("KERNEL_OK")
</pallas_src>

<mosaic_0001>
module attributes {stable_mosaic.version = 11 : i64} {
  func.func @kernel(%arg0: i32, %arg1: memref<8x4xf32, #tpu.memory_space<vmem>>, %arg2: memref<4x128xf32, #tpu.memory_space<vmem>>, %arg3: memref<1x128xf32, #tpu.memory_space<vmem>>, %arg4: memref<128x512xbf16, #tpu.memory_space<vmem>>, %arg5: memref<1x512xf32, #tpu.memory_space<vmem>>, %arg6: memref<512x256xbf16, #tpu.memory_space<vmem>>, %arg7: memref<256x256xbf16, #tpu.memory_space<vmem>>, %arg8: memref<1x256xf32, #tpu.memory_space<vmem>>, %arg9: memref<256x256xbf16, #tpu.memory_space<vmem>>, %arg10: memref<1x256xf32, #tpu.memory_space<vmem>>, %arg11: memref<256x16xbf16, #tpu.memory_space<vmem>>, %arg12: memref<8x16xf32, #tpu.memory_space<vmem>>) attributes {dimension_semantics = [#tpu.dimension_semantics<parallel>], iteration_bounds = array<i64: 1>, scalar_prefetch = 0 : i64, scratch_operands = 0 : i64, tpu.core_type = #tpu.core_type<tc>, window_params = [{transform_indices = @transform_0, window_bounds = array<i64: 8, 4>}, {pipeline_mode = #tpu.pipeline_mode<synchronous>, transform_indices = @transform_1, window_bounds = array<i64: 4, 128>}, {pipeline_mode = #tpu.pipeline_mode<synchronous>, transform_indices = @transform_2, window_bounds = array<i64: 1, 128>}, {pipeline_mode = #tpu.pipeline_mode<synchronous>, transform_indices = @transform_3, window_bounds = array<i64: 128, 512>}, {pipeline_mode = #tpu.pipeline_mode<synchronous>, transform_indices = @transform_4, window_bounds = array<i64: 1, 512>}, {pipeline_mode = #tpu.pipeline_mode<synchronous>, transform_indices = @transform_5, window_bounds = array<i64: 512, 256>}, {pipeline_mode = #tpu.pipeline_mode<synchronous>, transform_indices = @transform_6, window_bounds = array<i64: 256, 256>}, {pipeline_mode = #tpu.pipeline_mode<synchronous>, transform_indices = @transform_7, window_bounds = array<i64: 1, 256>}, {pipeline_mode = #tpu.pipeline_mode<synchronous>, transform_indices = @transform_8, window_bounds = array<i64: 256, 256>}, {pipeline_mode = #tpu.pipeline_mode<synchronous>, transform_indices = @transform_9, window_bounds = array<i64: 1, 256>}, {pipeline_mode = #tpu.pipeline_mode<synchronous>, transform_indices = @transform_10, window_bounds = array<i64: 256, 16>}, {transform_indices = @transform_11, window_bounds = array<i64: 8, 16>}]} {
    %c0 = arith.constant 0 : index
    %c0_0 = arith.constant 0 : index
    %0 = vector.load %arg1[%c0, %c0_0] : memref<8x4xf32, #tpu.memory_space<vmem>>, vector<8x1xf32>
    %c0_1 = arith.constant 0 : index
    %c0_2 = arith.constant 0 : index
    %1 = vector.load %arg2[%c0_1, %c0_2] : memref<4x128xf32, #tpu.memory_space<vmem>>, vector<1x128xf32>
    %2 = vector.broadcast %0 : vector<8x1xf32> to vector<8x128xf32>
    %3 = vector.broadcast %1 : vector<1x128xf32> to vector<8x128xf32>
    %4 = arith.mulf %2, %3 : vector<8x128xf32>
    %c0_3 = arith.constant 0 : index
    %c0_4 = arith.constant 0 : index
    %5 = vector.load %arg3[%c0_3, %c0_4] : memref<1x128xf32, #tpu.memory_space<vmem>>, vector<1x128xf32>
    %6 = vector.broadcast %5 : vector<1x128xf32> to vector<8x128xf32>
    %7 = arith.addf %4, %6 : vector<8x128xf32>
    %c0_5 = arith.constant 0 : index
    %c1 = arith.constant 1 : index
    %8 = vector.load %arg1[%c0_5, %c1] : memref<8x4xf32, #tpu.memory_space<vmem>>, vector<8x1xf32>
    %c1_6 = arith.constant 1 : index
    %c0_7 = arith.constant 0 : index
    %9 = vector.load %arg2[%c1_6, %c0_7] : memref<4x128xf32, #tpu.memory_space<vmem>>, vector<1x128xf32>
    %10 = vector.broadcast %8 : vector<8x1xf32> to vector<8x128xf32>
    %11 = vector.broadcast %9 : vector<1x128xf32> to vector<8x128xf32>
    %12 = arith.mulf %10, %11 : vector<8x128xf32>
    %13 = arith.addf %7, %12 : vector<8x128xf32>
    %c0_8 = arith.constant 0 : index
    %c2 = arith.constant 2 : index
    %14 = vector.load %arg1[%c0_8, %c2] : memref<8x4xf32, #tpu.memory_space<vmem>>, vector<8x1xf32>
    %c2_9 = arith.constant 2 : index
    %c0_10 = arith.constant 0 : index
    %15 = vector.load %arg2[%c2_9, %c0_10] : memref<4x128xf32, #tpu.memory_space<vmem>>, vector<1x128xf32>
    %16 = vector.broadcast %14 : vector<8x1xf32> to vector<8x128xf32>
    %17 = vector.broadcast %15 : vector<1x128xf32> to vector<8x128xf32>
    %18 = arith.mulf %16, %17 : vector<8x128xf32>
    %19 = arith.addf %13, %18 : vector<8x128xf32>
    %c0_11 = arith.constant 0 : index
    %c3 = arith.constant 3 : index
    %20 = vector.load %arg1[%c0_11, %c3] : memref<8x4xf32, #tpu.memory_space<vmem>>, vector<8x1xf32>
    %c3_12 = arith.constant 3 : index
    %c0_13 = arith.constant 0 : index
    %21 = vector.load %arg2[%c3_12, %c0_13] : memref<4x128xf32, #tpu.memory_space<vmem>>, vector<1x128xf32>
    %22 = vector.broadcast %20 : vector<8x1xf32> to vector<8x128xf32>
    %23 = vector.broadcast %21 : vector<1x128xf32> to vector<8x128xf32>
    %24 = arith.mulf %22, %23 : vector<8x128xf32>
    %25 = arith.addf %19, %24 : vector<8x128xf32>
    %cst = arith.constant 0.000000e+00 : f32
    %26 = vector.broadcast %cst : f32 to vector<8x128xf32>
    %27 = arith.maximumf %25, %26 : vector<8x128xf32>
    %cst_14 = arith.constant 0.000000e+00 : f32
    %28 = vector.broadcast %cst_14 : f32 to vector<8x128xf32>
    %29 = arith.minimumf %25, %28 : vector<8x128xf32>
    %30 = math.exp %29 : vector<8x128xf32>
    %cst_15 = arith.constant 1.000000e+00 : f32
    %31 = vector.broadcast %cst_15 : f32 to vector<8x128xf32>
    %32 = arith.subf %30, %31 : vector<8x128xf32>
    %33 = arith.addf %27, %32 : vector<8x128xf32>
    %34 = arith.truncf %33 : vector<8x128xf32> to vector<8x128xbf16>
    %c0_16 = arith.constant 0 : index
    %c0_17 = arith.constant 0 : index
    %35 = vector.load %arg4[%c0_16, %c0_17] : memref<128x512xbf16, #tpu.memory_space<vmem>>, vector<128x512xbf16>
    %cst_18 = arith.constant dense<0.000000e+00> : vector<8x512xf32>
    %36 = tpu.matmul %34, %35, %cst_18 {dimension_numbers = #tpu.dot_dimension_numbers<[1], [0], [0], [1], [0, 0, 1, 1], [], []>} : vector<8x128xbf16>, vector<128x512xbf16>, vector<8x512xf32> -> vector<8x512xf32>
    %c0_19 = arith.constant 0 : index
    %c0_20 = arith.constant 0 : index
    %37 = vector.load %arg5[%c0_19, %c0_20] : memref<1x512xf32, #tpu.memory_space<vmem>>, vector<1x512xf32>
    %38 = vector.broadcast %37 : vector<1x512xf32> to vector<8x512xf32>
    %39 = arith.addf %36, %38 : vector<8x512xf32>
    %cst_21 = arith.constant 0.000000e+00 : f32
    %40 = vector.broadcast %cst_21 : f32 to vector<8x512xf32>
    %41 = arith.maximumf %39, %40 : vector<8x512xf32>
    %42 = arith.truncf %41 : vector<8x512xf32> to vector<8x512xbf16>
    %c0_22 = arith.constant 0 : index
    %c0_23 = arith.constant 0 : index
    %43 = vector.load %arg6[%c0_22, %c0_23] : memref<512x256xbf16, #tpu.memory_space<vmem>>, vector<512x256xbf16>
    %cst_24 = arith.constant dense<0.000000e+00> : vector<8x256xf32>
    %44 = tpu.matmul %42, %43, %cst_24 {dimension_numbers = #tpu.dot_dimension_numbers<[1], [0], [0], [1], [0, 0, 1, 1], [], []>} : vector<8x512xbf16>, vector<512x256xbf16>, vector<8x256xf32> -> vector<8x256xf32>
    %45 = arith.truncf %44 : vector<8x256xf32> to vector<8x256xbf16>
    %c0_25 = arith.constant 0 : index
    %c0_26 = arith.constant 0 : index
    %46 = vector.load %arg7[%c0_25, %c0_26] : memref<256x256xbf16, #tpu.memory_space<vmem>>, vector<256x256xbf16>
    %cst_27 = arith.constant dense<0.000000e+00> : vector<8x256xf32>
    %47 = tpu.matmul %45, %46, %cst_27 {dimension_numbers = #tpu.dot_dimension_numbers<[1], [0], [0], [1], [0, 0, 1, 1], [], []>} : vector<8x256xbf16>, vector<256x256xbf16>, vector<8x256xf32> -> vector<8x256xf32>
    %c0_28 = arith.constant 0 : index
    %c0_29 = arith.constant 0 : index
    %48 = vector.load %arg8[%c0_28, %c0_29] : memref<1x256xf32, #tpu.memory_space<vmem>>, vector<1x256xf32>
    %49 = vector.broadcast %48 : vector<1x256xf32> to vector<8x256xf32>
    %50 = arith.addf %47, %49 : vector<8x256xf32>
    %cst_30 = arith.constant 0.000000e+00 : f32
    %51 = vector.broadcast %cst_30 : f32 to vector<8x256xf32>
    %52 = arith.maximumf %50, %51 : vector<8x256xf32>
    %53 = arith.addf %52, %44 : vector<8x256xf32>
    %54 = arith.truncf %53 : vector<8x256xf32> to vector<8x256xbf16>
    %c0_31 = arith.constant 0 : index
    %c0_32 = arith.constant 0 : index
    %55 = vector.load %arg9[%c0_31, %c0_32] : memref<256x256xbf16, #tpu.memory_space<vmem>>, vector<256x256xbf16>
    %cst_33 = arith.constant dense<0.000000e+00> : vector<8x256xf32>
    %56 = tpu.matmul %54, %55, %cst_33 {dimension_numbers = #tpu.dot_dimension_numbers<[1], [0], [0], [1], [0, 0, 1, 1], [], []>} : vector<8x256xbf16>, vector<256x256xbf16>, vector<8x256xf32> -> vector<8x256xf32>
    %c0_34 = arith.constant 0 : index
    %c0_35 = arith.constant 0 : index
    %57 = vector.load %arg10[%c0_34, %c0_35] : memref<1x256xf32, #tpu.memory_space<vmem>>, vector<1x256xf32>
    %58 = vector.broadcast %57 : vector<1x256xf32> to vector<8x256xf32>
    %59 = arith.addf %56, %58 : vector<8x256xf32>
    %cst_36 = arith.constant 0.000000e+00 : f32
    %60 = vector.broadcast %cst_36 : f32 to vector<8x256xf32>
    %61 = arith.maximumf %59, %60 : vector<8x256xf32>
    %62 = arith.truncf %61 : vector<8x256xf32> to vector<8x256xbf16>
    %c0_37 = arith.constant 0 : index
    %c0_38 = arith.constant 0 : index
    %63 = vector.load %arg11[%c0_37, %c0_38] : memref<256x16xbf16, #tpu.memory_space<vmem>>, vector<256x16xbf16>
    %cst_39 = arith.constant dense<0.000000e+00> : vector<8x16xf32>
    %64 = tpu.matmul %62, %63, %cst_39 {dimension_numbers = #tpu.dot_dimension_numbers<[1], [0], [0], [1], [0, 0, 1, 1], [], []>} : vector<8x256xbf16>, vector<256x16xbf16>, vector<8x16xf32> -> vector<8x16xf32>
    %c0_40 = arith.constant 0 : index
    %c0_41 = arith.constant 0 : index
    %65 = vector.load %arg12[%c0_40, %c0_41] : memref<8x16xf32, #tpu.memory_space<vmem>>, vector<8x16xf32>
    tpu.vector_store %arg12[%c0_40, %c0_41], %64 {strides = array<i32>} : memref<8x16xf32, #tpu.memory_space<vmem>>, vector<8x16xf32>,
    return
  }
  func.func @transform_0(%arg0: i32) -> (i32, i32) {
    %c0_i32 = arith.constant 0 : i32
    %c0_i32_0 = arith.constant 0 : i32
    return %arg0, %c0_i32 : i32, i32
  }
  func.func @transform_1(%arg0: i32) -> (i32, i32) {
    %c0_i32 = arith.constant 0 : i32
    %c0_i32_0 = arith.constant 0 : i32
    %c0_i32_1 = arith.constant 0 : i32
    return %c0_i32, %c0_i32_0 : i32, i32
  }
  func.func @transform_2(%arg0: i32) -> (i32, i32) {
    %c0_i32 = arith.constant 0 : i32
    %c0_i32_0 = arith.constant 0 : i32
    %c0_i32_1 = arith.constant 0 : i32
    return %c0_i32, %c0_i32_0 : i32, i32
  }
  func.func @transform_3(%arg0: i32) -> (i32, i32) {
    %c0_i32 = arith.constant 0 : i32
    %c0_i32_0 = arith.constant 0 : i32
    %c0_i32_1 = arith.constant 0 : i32
    return %c0_i32, %c0_i32_0 : i32, i32
  }
  func.func @transform_4(%arg0: i32) -> (i32, i32) {
    %c0_i32 = arith.constant 0 : i32
    %c0_i32_0 = arith.constant 0 : i32
    %c0_i32_1 = arith.constant 0 : i32
    return %c0_i32, %c0_i32_0 : i32, i32
  }
  func.func @transform_5(%arg0: i32) -> (i32, i32) {
    %c0_i32 = arith.constant 0 : i32
    %c0_i32_0 = arith.constant 0 : i32
    %c0_i32_1 = arith.constant 0 : i32
    return %c0_i32, %c0_i32_0 : i32, i32
  }
  func.func @transform_6(%arg0: i32) -> (i32, i32) {
    %c0_i32 = arith.constant 0 : i32
    %c0_i32_0 = arith.constant 0 : i32
    %c0_i32_1 = arith.constant 0 : i32
    return %c0_i32, %c0_i32_0 : i32, i32
  }
  func.func @transform_7(%arg0: i32) -> (i32, i32) {
    %c0_i32 = arith.constant 0 : i32
    %c0_i32_0 = arith.constant 0 : i32
    %c0_i32_1 = arith.constant 0 : i32
    return %c0_i32, %c0_i32_0 : i32, i32
  }
  func.func @transform_8(%arg0: i32) -> (i32, i32) {
    %c0_i32 = arith.constant 0 : i32
    %c0_i32_0 = arith.constant 0 : i32
    %c0_i32_1 = arith.constant 0 : i32
    return %c0_i32, %c0_i32_0 : i32, i32
  }
  func.func @transform_9(%arg0: i32) -> (i32, i32) {
    %c0_i32 = arith.constant 0 : i32
    %c0_i32_0 = arith.constant 0 : i32
    %c0_i32_1 = arith.constant 0 : i32
    return %c0_i32, %c0_i32_0 : i32, i32
  }
  func.func @transform_10(%arg0: i32) -> (i32, i32) {
    %c0_i32 = arith.constant 0 : i32
    %c0_i32_0 = arith.constant 0 : i32
    %c0_i32_1 = arith.constant 0 : i32
    return %c0_i32, %c0_i32_0 : i32, i32
  }
  func.func @transform_11(%arg0: i32) -> (i32, i32) {
    %c0_i32 = arith.constant 0 : i32
    %c0_i32_0 = arith.constant 0 : i32
    return %arg0, %c0_i32 : i32, i32
  }
}

</mosaic_0001>

<bundles_post_ra>
// kernel: tpu_custom_call.1
= control target key start
LH: loop header
LB: loop body
LE: loop exit
PB: predicated region body
PF: predicated region fallthrough
CT: control target
= control target key end

     0   :  { %16 = vsyncpa [#allocation3], 0  ;;  %s2475_s0 = inlined_call_operand.vmem [shape: f32[8,4], index: 0, kind: input, shape index: {}]   ;;  %s2476_s1 = inlined_call_operand.vmem [shape: f32[4,128], index: 1, kind: input, shape index: {}]   ;;  %s2477_s2 = inlined_call_operand.vmem [shape: f32[1,128], index: 2, kind: input, shape index: {}]   ;;  %s2478_s3 = inlined_call_operand.hbm [shape: bf16[128,512], index: 3, kind: input, shape index: {}]   ;;  %s2479_s4 = inlined_call_operand.vmem [shape: f32[1,512], index: 4, kind: input, shape index: {}]   ;;  %s2480_s5 = inlined_call_operand.hbm [shape: bf16[512,256], index: 5, kind: input, shape index: {}]   ;;  %s2481_s6 = inlined_call_operand.hbm [shape: bf16[256,256], index: 6, kind: input, shape index: {}]   ;;  %s2482_s7 = inlined_call_operand.vmem [shape: f32[1,256], index: 7, kind: input, shape index: {}]   ;;  %s2483_s8 = inlined_call_operand.hbm [shape: bf16[256,256], index: 8, kind: input, shape index: {}]   ;;  %s2484_s9 = inlined_call_operand.vmem [shape: f32[1,256], index: 9, kind: input, shape index: {}]   ;;  %s2485_s10 = inlined_call_operand.vmem [shape: bf16[256,16], index: 10, kind: input, shape index: {}]   ;;  %s2486_s11 = inlined_call_operand.hbm [shape: f32[8,16], index: 11, kind: output, shape index: {}]  }
   0x1   :  { %17 = vsyncpa [#allocation6], 0 }
   0x2   :  { %18 = vsyncpa [#allocation9], 0 }
   0x3   :  { %19 = vsyncpa [#allocation4], 0  ;;  %s2216_s17 = smov [#allocation5]   ;;  %s2098_s21 = scalar_lea.hbm %s2480_s5, 8192 }
   0x4   :  { %s45_s18 = sshll.u32 %s2216_s17, 4  ;;  %p2099_p0 = scmp.ne.s32.totalorder %s2480_s5, %s2098_s21  ;;  %s46_s18 = int_to_ptr.vmem [resolvable:$true] %s45_s18 }
   0x5   :  { %p2102_p1 = scmp.lt.u32.totalorder %s2098_s21, %s2480_s5 }
   0x7   :  { %p2104_p2 = pnand %p2102_p1, %p2099_p0 }
   0x9   :  { %2107 = shalt.err (!%p2104_p2)
}
   0xa   :  { %s2108_s26 = scalar_lea.vmem %s46_s18, 8192  ;;  %p2113_p4 = scmp.lt.s32.totalorder %s46_s18, %s46_s18 }
   0xb   :  { %p2109_p3 = scmp.ne.s32.totalorder %s46_s18, %s2108_s26  ;;  %p2114_p5 = scmp.lt.s32.totalorder %s2108_s26, %s2108_s26 }
   0xd   :  { %p2115_p6 = por %p2114_p5, %p2113_p4 }
   0xf   :  { %p2116_p7 = pnand %p2115_p6, %p2109_p3 }
  0x11   :  { %2119 = shalt.err (!%p2116_p7)
}
  0x12   :  { %s2217_s27 = smov 128   ;;  %s2218_s28 = smov 8  }
  0x13   :  { %51 = dma.hbm_to_vmem [thread:$0]  %s2480_s5, 8192, %s46_s18, [#allocation6], %s2217_s27, %s2217_s27, %s2218_s28  }
  0x14   :  { %s2219_s12 = smov [#allocation2]   ;;  %s2120_s16 = scalar_lea.hbm %s2478_s3, 4096 }
  0x15   :  { %s31_s13 = sshll.u32 %s2219_s12, 4  ;;  %p2121_p8 = scmp.ne.s32.totalorder %s2478_s3, %s2120_s16  ;;  %s32_s13 = int_to_ptr.vmem [resolvable:$true] %s31_s13 }
  0x16   :  { %p2124_p9 = scmp.lt.u32.totalorder %s2120_s16, %s2478_s3 }
  0x18   :  { %p2126_p10 = pnand %p2124_p9, %p2121_p8 }
  0x1a   :  { %2129 = shalt.err (!%p2126_p10)
}
  0x1b   :  { %s2130_s22 = scalar_lea.vmem %s32_s13, 4096  ;;  %p2135_p12 = scmp.lt.s32.totalorder %s32_s13, %s32_s13 }
  0x1c   :  { %p2131_p11 = scmp.ne.s32.totalorder %s32_s13, %s2130_s22  ;;  %p2136_p13 = scmp.lt.s32.totalorder %s2130_s22, %s2130_s22 }
  0x1e   :  { %p2137_p0 = por %p2136_p13, %p2135_p12 }
  0x20   :  { %p2138_p1 = pnand %p2137_p0, %p2131_p11 }
  0x22   :  { %2141 = shalt.err (!%p2138_p1)
}
  0x23   :  { %s2220_s5 = smov 256   ;;  %s2221_s18 = smov 16  }
  0x24   :  { %37 = dma.hbm_to_vmem [thread:$0]  %s2478_s3, 4096, %s32_s13, [#allocation3], %s2220_s5, %s2220_s5, %s2221_s18  }
  0x25   :  { %s2222_s25 = smov [#allocation7]   ;;  %s2223_s29 = smov [#allocation8]  }
  0x26   :  { %s57_s26 = sshll.u32 %s2222_s25, 4  ;;  %s71_s30 = sshll.u32 %s2223_s29, 4  ;;  %s58_s26 = int_to_ptr.vmem [resolvable:$true] %s57_s26  ;;  %s2316_s30 = int_to_ptr.vmem [resolvable:$true] %s71_s30 }
  0x27   :  { %s2142_s15 = scalar_lea.hbm %s2481_s6, 4096 }
  0x28   :  { %p2143_p2 = scmp.ne.s32.totalorder %s2481_s6, %s2142_s15  ;;  %p2146_p3 = scmp.lt.u32.totalorder %s2142_s15, %s2481_s6 }
  0x2a   :  { %p2148_p4 = pnand %p2146_p3, %p2143_p2 }
  0x2c   :  { %2151 = shalt.err (!%p2148_p4)
}
  0x2d   :  { %s2152_s3 = scalar_lea.vmem %s58_s26, 4096  ;;  %p2157_p6 = scmp.lt.s32.totalorder %s58_s26, %s58_s26 }
  0x2e   :  { %p2153_p5 = scmp.ne.s32.totalorder %s58_s26, %s2152_s3  ;;  %p2158_p7 = scmp.lt.s32.totalorder %s2152_s3, %s2152_s3 }
  0x30   :  { %p2159_p8 = por %p2158_p7, %p2157_p6 }
  0x32   :  { %p2160_p9 = pnand %p2159_p8, %p2153_p5 }
  0x34   :  { %2163 = shalt.err (!%p2160_p9)
}
  0x35   :  { %63 = dma.hbm_to_vmem [thread:$0]  %s2481_s6, 4096, %s58_s26, [#allocation6], %s2217_s27, %s2217_s27, %s2218_s28  }
  0x36   :  { %s2164_s18 = scalar_lea.hbm %s2483_s8, 4096 }
  0x37   :  { %p2165_p10 = scmp.ne.s32.totalorder %s2483_s8, %s2164_s18  ;;  %p2168_p11 = scmp.lt.u32.totalorder %s2164_s18, %s2483_s8 }
  0x39   :  { %p2170_p12 = pnand %p2168_p11, %p2165_p10 }
  0x3b   :  { %2173 = shalt.err (!%p2170_p12)
}
  0x3c   :  { %s2174_s12 = scalar_lea.vmem %s2316_s30, 4096  ;;  %p2179_p0 = scmp.lt.s32.totalorder %s2316_s30, %s2316_s30 }
  0x3d   :  { %p2175_p13 = scmp.ne.s32.totalorder %s2316_s30, %s2174_s12  ;;  %p2180_p1 = scmp.lt.s32.totalorder %s2174_s12, %s2174_s12 }
  0x3f   :  { %p2181_p2 = por %p2180_p1, %p2179_p0 }
  0x41   :  { %p2182_p3 = pnand %p2181_p2, %p2175_p13 }
  0x43   :  { %2185 = shalt.err (!%p2182_p3)
}
  0x44   :  { %77 = dma.hbm_to_vmem [thread:$0]  %s2483_s8, 4096, %s2316_s30, [#allocation9], %s2217_s27, %s2217_s27, %s2218_s28  }
  0x45   :  { %2208 = dma.done.wait [#allocation3], 4096  }
  0x46   :  { %2209 = vsyncadd [#allocation3], 4294963200 }
  0x47   :  { %2210 = dma.done.wait [#allocation6], 12288  }
  0x48   :  { %2211 = vsyncadd [#allocation6], 4294955008 }
  0x49   :  { %2212 = dma.done.wait [#allocation9], 4096  }
  0x4a   :  { %2213 = vsyncadd [#allocation9], 4294963200  ;;  %v2224_v0 = vmov 0   ;;  %v2225_v1 = vmov 2   ;;  %v95_v2 = vld [vmem:[%s2475_s0] sm:$0xff]  ;;  %v2226_v7 = vmov 1  }
  0x4b   :  { %1835 = vset.pattern.permute.xlu0 %v2224_v0  ;;  %1837 = vset.pattern.permute.xlu1 %v2225_v1  ;;  %v1840_v3 = vld [vmem:[#allocation2 + $0x4] ss:$16 sps:$4 sm:$0xff]   ;;  %v1842_v4 = vld [vmem:[#allocation2 + $0xc] ss:$16 sps:$4 sm:$0xff]   ;;  %v1844_v5 = vld [vmem:[#allocation2] ss:$16 sps:$4 sm:$0xff]  }
  0x4c   :  { %401 = vmatprep.mubr.bf16.mxu0 %v2224_v0  ;;  %442 = vmatprep.mubr.bf16.mxu1 %v2224_v0  ;;  %v1845_v6 = vld [vmem:[#allocation2 + $0x8] ss:$16 sps:$4 sm:$0xff]   ;;  %v2227_v8 = vmov 3   ;;  %v1846_v9 = vld [vmem:[#allocation2 + $0x24] ss:$16 sps:$4 sm:$0xff]   ;;  %vm1595_vm0 = vcmask 130048  }
  0x4d   :  { %99 = vperm.xlu0 %1835, %v95_v2   ;;  %128 = vperm.xlu1 %1837, %v95_v2   ;;  %v1848_v10 = vld [vmem:[#allocation2 + $0x2c] ss:$16 sps:$4 sm:$0xff]   ;;  %v1850_v11 = vld [vmem:[#allocation2 + $0x20] ss:$16 sps:$4 sm:$0xff]   ;;  %v1851_v12 = vld [vmem:[#allocation2 + $0x28] ss:$16 sps:$4 sm:$0xff]  }
  0x4e   :  { %369 = vmatprep.subr.bf16.mxu0 %v1840_v3  ;;  %410 = vmatprep.subr.bf16.mxu1 %v1842_v4  ;;  %v1852_v13 = vld [vmem:[#allocation2 + $0x44] ss:$16 sps:$4 sm:$0xff]   ;;  %v1854_v14 = vld [vmem:[#allocation2 + $0x4c] ss:$16 sps:$4 sm:$0xff]   ;;  %v1856_v15 = vld [vmem:[#allocation2 + $0x40] ss:$16 sps:$4 sm:$0xff]  }
  0x4f   :  { %370 = vmatpush1.bf16.msra.mxu0 %v1844_v5  ;;  %411 = vmatpush1.bf16.msra.mxu1 %v1845_v6  ;;  %v1857_v16 = vld [vmem:[#allocation2 + $0x48] ss:$16 sps:$4 sm:$0xff]   ;;  %v1858_v17 = vld [vmem:[#allocation2 + $0x64] ss:$16 sps:$4 sm:$0xff]   ;;  %v1860_v18 = vld [vmem:[#allocation2 + $0x6c] ss:$16 sps:$4 sm:$0xff]  }
  0x50   :  { %371 = vmatprep.subr.bf16.mxu0 %v1846_v9  ;;  %412 = vmatprep.subr.bf16.mxu1 %v1848_v10  ;;  %v1862_v19 = vld [vmem:[#allocation2 + $0x60] ss:$16 sps:$4 sm:$0xff]   ;;  %v1863_v20 = vld [vmem:[#allocation2 + $0x68] ss:$16 sps:$4 sm:$0xff]   ;;  %v1864_v21 = vld [vmem:[#allocation2 + $0x84] ss:$16 sps:$4 sm:$0xff]  }
  0x51   :  { %1836 = vset.pattern.permute.xlu0 %v2226_v7  ;;  %1838 = vset.pattern.permute.xlu1 %v2227_v8  ;;  %v1866_v22 = vld [vmem:[#allocation2 + $0x8c] ss:$16 sps:$4 sm:$0xff]   ;;  %v1868_v23 = vld [vmem:[#allocation2 + $0x80] ss:$16 sps:$4 sm:$0xff]   ;;  %v1869_v24 = vld [vmem:[#allocation2 + $0x88] ss:$16 sps:$4 sm:$0xff]  }
  0x52   :  { %117 = vperm.xlu0 %1836, %v95_v2   ;;  %139 = vperm.xlu1 %1838, %v95_v2   ;;  %v1870_v25 = vld [vmem:[#allocation2 + $0xa4] ss:$16 sps:$4 sm:$0xff]   ;;  %v1872_v26 = vld [vmem:[#allocation2 + $0xac] ss:$16 sps:$4 sm:$0xff]   ;;  %v1874_v27 = vld [vmem:[#allocation2 + $0xa0] ss:$16 sps:$4 sm:$0xff]  }
  0x53   :  { %372 = vmatpush1.bf16.msra.mxu0 %v1850_v11  ;;  %413 = vmatpush1.bf16.msra.mxu1 %v1851_v12  ;;  %v1875_v28 = vld [vmem:[#allocation2 + $0xa8] ss:$16 sps:$4 sm:$0xff]   ;;  %v1876_v29 = vld [vmem:[#allocation2 + $0xc4] ss:$16 sps:$4 sm:$0xff]   ;;  %v1878_v30 = vld [vmem:[#allocation2 + $0xcc] ss:$16 sps:$4 sm:$0xff]  }
  0x54   :  { %373 = vmatprep.subr.bf16.mxu0 %v1852_v13  ;;  %414 = vmatprep.subr.bf16.mxu1 %v1854_v14  ;;  %v1880_v31 = vld [vmem:[#allocation2 + $0xc0] ss:$16 sps:$4 sm:$0xff]   ;;  %v1881_v32 = vld [vmem:[#allocation2 + $0xc8] ss:$16 sps:$4 sm:$0xff]   ;;  %v1882_v33 = vld [vmem:[#allocation2 + $0xe4] ss:$16 sps:$4 sm:$0xff]  }
  0x55   :  { %v1884_v34 = vld [vmem:[#allocation2 + $0xec] ss:$16 sps:$4 sm:$0xff]   ;;  %v1886_v35 = vld [vmem:[#allocation2 + $0xe0] ss:$16 sps:$4 sm:$0xff]   ;;  %v1887_v36 = vld [vmem:[#allocation2 + $0xe8] ss:$16 sps:$4 sm:$0xff]  }
  0x56   :  { %1839 = vset.pattern.permute.xlu0 %v2227_v8  ;;  %v1890_v37 = vld [vmem:[#allocation5 + $0x4] ss:$8 sps:$4 sm:$0xff]   ;;  %v1614_v38 = vld [vmem:[%s2476_s1] ss:$0 sm:$0xff]  ;;  %v1616_v43 = vld [vmem:[%s2476_s1 + $0x1] ss:$0 sm:$0xff] }
  0x57   :  { %374 = vmatpush1.bf16.msra.mxu0 %v1856_v15  ;;  %415 = vmatpush1.bf16.msra.mxu1 %v1857_v16  ;;  %v1615_v42 = vld [vmem:[%s2477_s2] ss:$0 sm:$0xff]  ;;  %v1617_v44 = vld [vmem:[%s2476_s1 + $0x2] ss:$0 sm:$0xff]  ;;  %v1618_v46 = vld [vmem:[%s2476_s1 + $0x3] ss:$0 sm:$0xff] }
  0x58   :  { %375 = vmatprep.subr.bf16.mxu0 %v1858_v17  ;;  %416 = vmatprep.subr.bf16.mxu1 %v1860_v18  ;;  %v1888_v61 = vld [vmem:[#allocation5] ss:$8 sps:$4 sm:$0xff]   ;;  %v1893_v63 = vld [vmem:[#allocation5 + $0x14] ss:$8 sps:$4 sm:$0xff]   ;;  %v1891_v0 = vld [vmem:[#allocation5 + $0x10] ss:$8 sps:$4 sm:$0xff]  }
  0x59   :  { %v1896_v1 = vld [vmem:[#allocation5 + $0x24] ss:$8 sps:$4 sm:$0xff]   ;;  %v1894_v2 = vld [vmem:[#allocation5 + $0x20] ss:$8 sps:$4 sm:$0xff]   ;;  %v1899_v3 = vld [vmem:[#allocation5 + $0x34] ss:$8 sps:$4 sm:$0xff]  }
  0x5a   :  { %v1897_v4 = vld [vmem:[#allocation5 + $0x30] ss:$8 sps:$4 sm:$0xff]   ;;  %v1902_v5 = vld [vmem:[#allocation5 + $0x44] ss:$8 sps:$4 sm:$0xff]   ;;  %v1900_v6 = vld [vmem:[#allocation5 + $0x40] ss:$8 sps:$4 sm:$0xff]  }
  0x5b   :  { %376 = vmatpush1.bf16.msra.mxu0 %v1862_v19  ;;  %417 = vmatpush1.bf16.msra.mxu1 %v1863_v20  ;;  %v1905_v7 = vld [vmem:[#allocation5 + $0x54] ss:$8 sps:$4 sm:$0xff]   ;;  %v1903_v8 = vld [vmem:[#allocation5 + $0x50] ss:$8 sps:$4 sm:$0xff]   ;;  %v1908_v9 = vld [vmem:[#allocation5 + $0x64] ss:$8 sps:$4 sm:$0xff]  }
  0x5c   :  { %377 = vmatprep.subr.bf16.mxu0 %v1864_v21  ;;  %418 = vmatprep.subr.bf16.mxu1 %v1866_v22  ;;  %v1906_v10 = vld [vmem:[#allocation5 + $0x60] ss:$8 sps:$4 sm:$0xff]   ;;  %v1911_v11 = vld [vmem:[#allocation5 + $0x74] ss:$8 sps:$4 sm:$0xff]   ;;  %v1909_v12 = vld [vmem:[#allocation5 + $0x70] ss:$8 sps:$4 sm:$0xff]  }
  0x5d   :  { %v1914_v13 = vld [vmem:[#allocation5 + $0x84] ss:$8 sps:$4 sm:$0xff]   ;;  %v1912_v14 = vld [vmem:[#allocation5 + $0x80] ss:$8 sps:$4 sm:$0xff]   ;;  %v1917_v15 = vld [vmem:[#allocation5 + $0x94] ss:$8 sps:$4 sm:$0xff]  }
  0x5e   :  { %v1915_v16 = vld [vmem:[#allocation5 + $0x90] ss:$8 sps:$4 sm:$0xff]   ;;  %v1920_v17 = vld [vmem:[#allocation5 + $0xa4] ss:$8 sps:$4 sm:$0xff]   ;;  %v1918_v18 = vld [vmem:[#allocation5 + $0xa0] ss:$8 sps:$4 sm:$0xff]  }
  0x5f   :  { %378 = vmatpush1.bf16.msra.mxu0 %v1868_v23  ;;  %419 = vmatpush1.bf16.msra.mxu1 %v1869_v24  ;;  %v1923_v19 = vld [vmem:[#allocation5 + $0xb4] ss:$8 sps:$4 sm:$0xff]   ;;  %v1921_v20 = vld [vmem:[#allocation5 + $0xb0] ss:$8 sps:$4 sm:$0xff]   ;;  %v1926_v21 = vld [vmem:[#allocation5 + $0xc4] ss:$8 sps:$4 sm:$0xff]  }
  0x60   :  { %379 = vmatprep.subr.bf16.mxu0 %v1870_v25  ;;  %420 = vmatprep.subr.bf16.mxu1 %v1872_v26  ;;  %v1924_v22 = vld [vmem:[#allocation5 + $0xc0] ss:$8 sps:$4 sm:$0xff]   ;;  %v1929_v23 = vld [vmem:[#allocation5 + $0xd4] ss:$8 sps:$4 sm:$0xff]   ;;  %v1927_v24 = vld [vmem:[#allocation5 + $0xd0] ss:$8 sps:$4 sm:$0xff]  }
  0x61   :  { %v1932_v25 = vld [vmem:[#allocation5 + $0xe4] ss:$8 sps:$4 sm:$0xff]   ;;  %v1930_v26 = vld [vmem:[#allocation5 + $0xe0] ss:$8 sps:$4 sm:$0xff]  }
  0x63   :  { %380 = vmatpush1.bf16.msra.mxu0 %v1874_v27  ;;  %421 = vmatpush1.bf16.msra.mxu1 %v1875_v28  ;;  %v1935_v27 = vld [vmem:[#allocation5 + $0xf4] ss:$8 sps:$4 sm:$0xff]   ;;  %v1933_v28 = vld [vmem:[#allocation5 + $0xf0] ss:$8 sps:$4 sm:$0xff]  }
  0x64   :  { %381 = vmatprep.subr.bf16.mxu0 %v1876_v29  ;;  %422 = vmatprep.subr.bf16.mxu1 %v1878_v30  ;;  %v1938_v29 = vld [vmem:[#allocation5 + $0x104] ss:$8 sps:$4 sm:$0xff]   ;;  %v1984_v30 = vld [vmem:[#allocation7] ss:$8 sps:$4 sm:$0xff]  }
  0x67   :  { %382 = vmatpush1.bf16.msra.mxu0 %v1880_v31  ;;  %423 = vmatpush1.bf16.msra.mxu1 %v1881_v32  ;;  %v1986_v31 = vld [vmem:[#allocation7 + $0x4] ss:$8 sps:$4 sm:$0xff]   ;;  %v1989_v32 = vld [vmem:[#allocation7 + $0x14] ss:$8 sps:$4 sm:$0xff]  }
  0x68   :  { %383 = vmatprep.subr.bf16.mxu0 %v1882_v33  ;;  %424 = vmatprep.subr.bf16.mxu1 %v1884_v34  ;;  %v1987_v33 = vld [vmem:[#allocation7 + $0x10] ss:$8 sps:$4 sm:$0xff]   ;;  %v1992_v34 = vld [vmem:[#allocation7 + $0x24] ss:$8 sps:$4 sm:$0xff]  }
  0x6b   :  { %384 = vmatpush1.bf16.msra.mxu0 %v1886_v35  ;;  %425 = vmatpush1.bf16.msra.mxu1 %v1887_v36  ;;  %v1990_v35 = vld [vmem:[#allocation7 + $0x20] ss:$8 sps:$4 sm:$0xff]   ;;  %v1995_v36 = vld [vmem:[#allocation7 + $0x34] ss:$8 sps:$4 sm:$0xff]  }
  0x6c   :  { %843 = vmatprep.subr.bf16.mxu0 %v1890_v37  ;;  %1131 = vmatprep.subr.bf16.mxu1 %v1986_v31  ;;  %v1993_v37 = vld [vmem:[#allocation7 + $0x30] ss:$8 sps:$4 sm:$0xff]   ;;  %v1953_v31 = vld [vmem:[#allocation5 + $0x154] ss:$8 sps:$4 sm:$0xff]  }
  0xcc   :  { %v100_v39 = vpop.permute.xlu0 %99  ;;  %v129_v40 = vpop.permute.xlu1 %128 }
  0xcd   :  { %v106_v41 = vmul.f32 %v1614_v38, %v100_v39  ;;  %v135_v50 = vmul.f32 %v1617_v44, %v129_v40  ;;  %v1998_v38 = vld [vmem:[#allocation7 + $0x44] ss:$8 sps:$4 sm:$0xff]   ;;  %v1996_v39 = vld [vmem:[#allocation7 + $0x40] ss:$8 sps:$4 sm:$0xff]   ;;  %v2001_v40 = vld [vmem:[#allocation7 + $0x54] ss:$8 sps:$4 sm:$0xff]  }
  0xce   :  { %v2007_v44 = vld [vmem:[#allocation7 + $0x74] ss:$8 sps:$4 sm:$0xff]  }
  0xcf   :  { %v114_v48 = vadd.f32 %v1615_v42, %v106_v41  ;;  %v1999_v41 = vld [vmem:[#allocation7 + $0x50] ss:$8 sps:$4 sm:$0xff]   ;;  %v2004_v42 = vld [vmem:[#allocation7 + $0x64] ss:$8 sps:$4 sm:$0xff]  }
  0xd1   :  { %v118_v45 = vpop.permute.xlu0 %117  ;;  %v140_v47 = vpop.permute.xlu1 %139 }
  0xd2   :  { %v124_v49 = vmul.f32 %v1616_v43, %v118_v45  ;;  %v146_v52 = vmul.f32 %v1618_v46, %v140_v47  ;;  %v2002_v43 = vld [vmem:[#allocation7 + $0x60] ss:$8 sps:$4 sm:$0xff]   ;;  %v2005_v45 = vld [vmem:[#allocation7 + $0x70] ss:$8 sps:$4 sm:$0xff]   ;;  %v2010_v46 = vld [vmem:[#allocation7 + $0x84] ss:$8 sps:$4 sm:$0xff]  }
  0xd3   :  { %v2008_v47 = vld [vmem:[#allocation7 + $0x80] ss:$8 sps:$4 sm:$0xff]  }
  0xd4   :  { %v125_v51 = vadd.f32 %v124_v49, %v114_v48  ;;  %v2013_v48 = vld [vmem:[#allocation7 + $0x94] ss:$8 sps:$4 sm:$0xff]   ;;  %v2011_v49 = vld [vmem:[#allocation7 + $0x90] ss:$8 sps:$4 sm:$0xff]  }
  0xd6   :  { %v136_v53 = vadd.f32 %v135_v50, %v125_v51  ;;  %v2016_v50 = vld [vmem:[#allocation7 + $0xa4] ss:$8 sps:$4 sm:$0xff]   ;;  %v2014_v51 = vld [vmem:[#allocation7 + $0xa0] ss:$8 sps:$4 sm:$0xff]  }
  0xd8   :  { %v147_v54 = vadd.f32 %v146_v52, %v136_v53  ;;  %v189_v52 = vlaneseq  ;;  %v2019_v53 = vld [vmem:[#allocation7 + $0xb4] ss:$8 sps:$4 sm:$0xff]  }
  0xda   :  { %v149_v55 = vmin.f32 %v147_v54, 0.0  ;;  %v148_v58 = vmax.f32 %v147_v54, 0.0  ;;  %v2017_v54 = vld [vmem:[#allocation7 + $0xb0] ss:$8 sps:$4 sm:$0xff]  }
  0xdc   :  { %v150_v56 = vmul.f32 1.442695, %v149_v55  ;;  %v2371_v55 = vshrl.u32 %v189_v52, 7  ;;  %v1978_v52 = vld [vmem:[#allocation5 + $0x1e0] ss:$8 sps:$4 sm:$0xff]  }
  0xde   :  { %2096 = vpow2.f32 %v150_v56  ;;  %v2022_v56 = vld [vmem:[#allocation7 + $0xc4] ss:$8 sps:$4 sm:$0xff]  }
  0xe8   :  { %v2097_v57 = vpop.eup %2096 }
  0xe9   :  { %v1619_v59 = vadd.f32 -1.0, %v2097_v57  ;;  %v2020_v57 = vld [vmem:[#allocation7 + $0xc0] ss:$8 sps:$4 sm:$0xff]  }
  0xeb   :  { %v153_v60 = vadd.f32 %v1619_v59, %v148_v58  ;;  %v2374_v58 = vsub.s32 0, %v2371_v55  ;;  %v2025_v59 = vld [vmem:[#allocation7 + $0xd4] ss:$8 sps:$4 sm:$0xff]  }
  0xed   :  { %v154_v62 = vpack.c.bf16 %v153_v60, %v153_v60  ;;  %v2379_v60 = vld [vmem:[%s2479_s4] sm:$0xf] }
  0xef   :  { %402 = vmatmul.mubr.bf16.vlgmr.msra.gmra.mrb[0].mxu0 %v154_v62  ;;  %443 = vmatmul.mubr.bf16.vlgmr.msra.gmra.mrb[0].mxu1 %v154_v62  ;;  %v203_v62 = vsub.s32 3, %v2371_v55 }
  0xf0   :  { %844 = vmatpush1.bf16.msra.mxu0 %v1888_v61  ;;  %1132 = vmatpush1.bf16.msra.mxu1 %v1984_v30  ;;  %v2382_v61 = vsub.s32 1, %v2371_v55  ;;  %v1948_v30 = vld [vmem:[#allocation5 + $0x140] ss:$8 sps:$4 sm:$0xff]  }
  0xf1   :  { %845 = vmatprep.subr.bf16.mxu0 %v1893_v63  ;;  %1133 = vmatprep.subr.bf16.mxu1 %v1989_v32  ;;  %v2023_v63 = vld [vmem:[#allocation7 + $0xd0] ss:$8 sps:$4 sm:$0xff]  }
  0xf2   :  { %v1951_v32 = vld [vmem:[#allocation5 + $0x150] ss:$8 sps:$4 sm:$0xff]  }
  0xf4   :  { %846 = vmatpush1.bf16.msra.mxu0 %v1891_v0  ;;  %1134 = vmatpush1.bf16.msra.mxu1 %v1987_v33  ;;  %v192_v0 = vrot.slane %v2379_v60, %v2374_v58  ;;  %v1956_v33 = vld [vmem:[#allocation5 + $0x164] ss:$8 sps:$4 sm:$0xff]  }
  0xf5   :  { %847 = vmatprep.subr.bf16.mxu0 %v1896_v1  ;;  %1135 = vmatprep.subr.bf16.mxu1 %v1992_v34  ;;  %v2028_v1 = vld [vmem:[#allocation7 + $0xe4] ss:$8 sps:$4 sm:$0xff]   ;;  %v1954_v34 = vld [vmem:[#allocation5 + $0x160] ss:$8 sps:$4 sm:$0xff]  }
  0xf8   :  { %848 = vmatpush1.bf16.msra.mxu0 %v1894_v2  ;;  %1136 = vmatpush1.bf16.msra.mxu1 %v1990_v35  ;;  %v196_v2 = vrot.slane %v2379_v60, %v2382_v61  ;;  %v1959_v35 = vld [vmem:[#allocation5 + $0x174] ss:$8 sps:$4 sm:$0xff]  }
  0xf9   :  { %849 = vmatprep.subr.bf16.mxu0 %v1899_v3  ;;  %1137 = vmatprep.subr.bf16.mxu1 %v1995_v36  ;;  %v204_v3 = vrot.slane %v2379_v60, %v203_v62  ;;  %v1957_v36 = vld [vmem:[#allocation5 + $0x170] ss:$8 sps:$4 sm:$0xff]  }
  0xfa   :  { %v2029_v62 = vld [vmem:[#allocation7 + $0xf0] ss:$8 sps:$4 sm:$0xff]  }
  0xfc   :  { %850 = vmatpush1.bf16.msra.mxu0 %v1897_v4  ;;  %1138 = vmatpush1.bf16.msra.mxu1 %v1993_v37  ;;  %v1962_v37 = vld [vmem:[#allocation5 + $0x184] ss:$8 sps:$4 sm:$0xff]  }
  0xfd   :  { %851 = vmatprep.subr.bf16.mxu0 %v1902_v5  ;;  %1139 = vmatprep.subr.bf16.mxu1 %v1998_v38  ;;  %v1960_v38 = vld [vmem:[#allocation5 + $0x180] ss:$8 sps:$4 sm:$0xff]  }
 0x100   :  { %852 = vmatpush1.bf16.msra.mxu0 %v1900_v6  ;;  %1140 = vmatpush1.bf16.msra.mxu1 %v1996_v39  ;;  %v2026_v6 = vld [vmem:[#allocation7 + $0xe0] ss:$8 sps:$4 sm:$0xff]   ;;  %v1965_v39 = vld [vmem:[#allocation5 + $0x194] ss:$8 sps:$4 sm:$0xff]  }
 0x101   :  { %853 = vmatprep.subr.bf16.mxu0 %v1905_v7  ;;  %1141 = vmatprep.subr.bf16.mxu1 %v2001_v40  ;;  %v1963_v40 = vld [vmem:[#allocation5 + $0x190] ss:$8 sps:$4 sm:$0xff]  }
 0x104   :  { %854 = vmatpush1.bf16.msra.mxu0 %v1903_v8  ;;  %1142 = vmatpush1.bf16.msra.mxu1 %v1999_v41  ;;  %v1968_v41 = vld [vmem:[#allocation5 + $0x1a4] ss:$8 sps:$4 sm:$0xff]  }
 0x105   :  { %855 = vmatprep.subr.bf16.mxu0 %v1908_v9  ;;  %1143 = vmatprep.subr.bf16.mxu1 %v2004_v42  ;;  %v1966_v42 = vld [vmem:[#allocation5 + $0x1a0] ss:$8 sps:$4 sm:$0xff]  }
 0x108   :  { %856 = vmatpush1.bf16.msra.mxu0 %v1906_v10  ;;  %1144 = vmatpush1.bf16.msra.mxu1 %v2002_v43  ;;  %v1971_v43 = vld [vmem:[#allocation5 + $0x1b4] ss:$8 sps:$4 sm:$0xff]  }
 0x109   :  { %857 = vmatprep.subr.bf16.mxu0 %v1911_v11  ;;  %1145 = vmatprep.subr.bf16.mxu1 %v2007_v44  ;;  %v1969_v44 = vld [vmem:[#allocation5 + $0x1b0] ss:$8 sps:$4 sm:$0xff]  }
 0x10c   :  { %858 = vmatpush1.bf16.msra.mxu0 %v1909_v12  ;;  %1146 = vmatpush1.bf16.msra.mxu1 %v2005_v45  ;;  %v1974_v45 = vld [vmem:[#allocation5 + $0x1c4] ss:$8 sps:$4 sm:$0xff]  }
 0x10d   :  { %859 = vmatprep.subr.bf16.mxu0 %v1914_v13  ;;  %1147 = vmatprep.subr.bf16.mxu1 %v2010_v46  ;;  %v1972_v46 = vld [vmem:[#allocation5 + $0x1c0] ss:$8 sps:$4 sm:$0xff]  }
 0x110   :  { %860 = vmatpush1.bf16.msra.mxu0 %v1912_v14  ;;  %1148 = vmatpush1.bf16.msra.mxu1 %v2008_v47  ;;  %v199_v47 = vsub.s32 2, %v2371_v55 }
 0x111   :  { %861 = vmatprep.subr.bf16.mxu0 %v1917_v15  ;;  %1149 = vmatprep.subr.bf16.mxu1 %v2013_v48  ;;  %v1977_v48 = vld [vmem:[#allocation5 + $0x1d4] ss:$8 sps:$4 sm:$0xff]  }
 0x114   :  { %862 = vmatpush1.bf16.msra.mxu0 %v1915_v16  ;;  %1150 = vmatpush1.bf16.msra.mxu1 %v2011_v49  ;;  %v1975_v49 = vld [vmem:[#allocation5 + $0x1d0] ss:$8 sps:$4 sm:$0xff]  }
 0x115   :  { %863 = vmatprep.subr.bf16.mxu0 %v1920_v17  ;;  %1151 = vmatprep.subr.bf16.mxu1 %v2016_v50  ;;  %v200_v50 = vrot.slane %v2379_v60, %v199_v47  ;;  %v2034_v60 = vld [vmem:[#allocation8 + $0x4] ss:$8 sps:$4 sm:$0xff]   ;;  %v2091_v47 = vld [vmem:[%s2485_s10 + $0x28] sm:$0xff]  }
 0x118   :  { %864 = vmatpush1.bf16.msra.mxu0 %v1918_v18  ;;  %1152 = vmatpush1.bf16.msra.mxu1 %v2014_v51  ;;  %v1980_v51 = vld [vmem:[#allocation5 + $0x1e4] ss:$8 sps:$4 sm:$0xff]  }
 0x119   :  { %865 = vmatprep.subr.bf16.mxu0 %v1923_v19  ;;  %1153 = vmatprep.subr.bf16.mxu1 %v2019_v53 }
 0x11c   :  { %866 = vmatpush1.bf16.msra.mxu0 %v1921_v20  ;;  %1154 = vmatpush1.bf16.msra.mxu1 %v2017_v54  ;;  %v1936_v20 = vld [vmem:[#allocation5 + $0x100] ss:$8 sps:$4 sm:$0xff]   ;;  %v1983_v54 = vld [vmem:[#allocation5 + $0x1f4] ss:$8 sps:$4 sm:$0xff]  }
 0x11d   :  { %867 = vmatprep.subr.bf16.mxu0 %v1926_v21  ;;  %1155 = vmatprep.subr.bf16.mxu1 %v2022_v56  ;;  %v1981_v56 = vld [vmem:[#allocation5 + $0x1f0] ss:$8 sps:$4 sm:$0xff]  }
 0x120   :  { %868 = vmatpush1.bf16.msra.mxu0 %v1924_v22  ;;  %1156 = vmatpush1.bf16.msra.mxu1 %v2020_v57  ;;  %v1941_v22 = vld [vmem:[#allocation5 + $0x114] ss:$8 sps:$4 sm:$0xff]  }
 0x121   :  { %869 = vmatprep.subr.bf16.mxu0 %v1929_v23  ;;  %1157 = vmatprep.subr.bf16.mxu1 %v2025_v59  ;;  %v2031_v59 = vld [vmem:[#allocation7 + $0xf4] ss:$8 sps:$4 sm:$0xff]  }
 0x124   :  { %870 = vmatpush1.bf16.msra.mxu0 %v1927_v24  ;;  %1158 = vmatpush1.bf16.msra.mxu1 %v2023_v63  ;;  %v1939_v24 = vld [vmem:[#allocation5 + $0x110] ss:$8 sps:$4 sm:$0xff]  }
 0x125   :  { %871 = vmatprep.subr.bf16.mxu0 %v1932_v25  ;;  %1159 = vmatprep.subr.bf16.mxu1 %v2028_v1  ;;  %v1944_v25 = vld [vmem:[#allocation5 + $0x124] ss:$8 sps:$4 sm:$0xff]  }
 0x128   :  { %872 = vmatpush1.bf16.msra.mxu0 %v1930_v26  ;;  %1160 = vmatpush1.bf16.msra.mxu1 %v2026_v6  ;;  %v1942_v26 = vld [vmem:[#allocation5 + $0x120] ss:$8 sps:$4 sm:$0xff]   ;;  %v2037_v6 = vld [vmem:[#allocation8 + $0x14] ss:$8 sps:$4 sm:$0xff]  }
 0x129   :  { %873 = vmatprep.subr.bf16.mxu0 %v1935_v27  ;;  %v1947_v27 = vld [vmem:[#allocation5 + $0x134] ss:$8 sps:$4 sm:$0xff]   ;;  %1161 = vmatprep.subr.bf16.mxu1 %v2031_v59 }
 0x12c   :  { %874 = vmatpush1.bf16.msra.mxu0 %v1933_v28  ;;  %v1945_v28 = vld [vmem:[#allocation5 + $0x130] ss:$8 sps:$4 sm:$0xff]   ;;  %1162 = vmatpush1.bf16.msra.mxu1 %v2029_v62 }
 0x12d   :  { %884 = vmatprep.subr.bf16.mxu0 %v1938_v29  ;;  %v1950_v29 = vld [vmem:[#allocation5 + $0x144] ss:$8 sps:$4 sm:$0xff]   ;;  %1382 = vmatprep.subr.bf16.mxu1 %v2034_v60 }
 0x1c2   :  { %v403_v4 = vpop.f32.mrb[0].mxu0  ;;  %v2390_v5 = vpop.f32.mrb[0].mxu1 }
 0x1c3   :  { %v404_v7 = vadd.f32 %v403_v4, %v192_v0  ;;  %v405_v8 = vpop.f32.mrb[1].mxu0  ;;  %v446_v9 = vpop.f32.mrb[1].mxu1  ;;  %v445_v53 = vadd.f32 %v2390_v5, %v200_v50 }
 0x1c4   :  { %v406_v10 = vadd.f32 %v405_v8, %v196_v2  ;;  %v447_v11 = vadd.f32 %v446_v9, %v204_v3  ;;  %v407_v12 = vpop.f32.mrb[2].mxu0  ;;  %v448_v13 = vpop.f32.mrb[2].mxu1  ;;  %v2032_v3 = vld [vmem:[#allocation8] ss:$8 sps:$4 sm:$0xff]   ;;  %v2040_v8 = vld [vmem:[#allocation8 + $0x24] ss:$8 sps:$4 sm:$0xff]  }
 0x1c5   :  { %v451_v14 = vmax.f32 %v404_v7, 0.0  ;;  %v408_v15 = vpop.f32.mrb[3].mxu0  ;;  %v449_v16 = vpop.f32.mrb[3].mxu1  ;;  %v453_v57 = vmax.f32 %v445_v53, 0.0  ;;  %v2035_v7 = vld [vmem:[#allocation8 + $0x10] ss:$8 sps:$4 sm:$0xff]  }
 0x1c6   :  { %v452_v17 = vmax.f32 %v406_v10, 0.0  ;;  %v454_v18 = vmax.f32 %v447_v11, 0.0  ;;  %v2038_v9 = vld [vmem:[#allocation8 + $0x20] ss:$8 sps:$4 sm:$0xff]   ;;  %v2043_v10 = vld [vmem:[#allocation8 + $0x34] ss:$8 sps:$4 sm:$0xff]  }
 0x1c7   :  { %v455_v21 = vpack.c.bf16 %v451_v14, %v451_v14  ;;  %v457_v55 = vpack.c.bf16 %v453_v57, %v453_v57  ;;  %v2041_v11 = vld [vmem:[#allocation8 + $0x30] ss:$8 sps:$4 sm:$0xff]   ;;  %v2046_v12 = vld [vmem:[#allocation8 + $0x44] ss:$8 sps:$4 sm:$0xff]   ;;  %v2044_v13 = vld [vmem:[#allocation8 + $0x40] ss:$8 sps:$4 sm:$0xff]  }
 0x1c8   :  { %v456_v19 = vpack.c.bf16 %v452_v17, %v452_v17  ;;  %v458_v23 = vpack.c.bf16 %v454_v18, %v454_v18  ;;  %v2049_v14 = vld [vmem:[#allocation8 + $0x54] ss:$8 sps:$4 sm:$0xff]   ;;  %v2047_v15 = vld [vmem:[#allocation8 + $0x50] ss:$8 sps:$4 sm:$0xff]   ;;  %v2052_v16 = vld [vmem:[#allocation8 + $0x64] ss:$8 sps:$4 sm:$0xff]  }
 0x1c9   :  { %v2050_v17 = vld [vmem:[#allocation8 + $0x60] ss:$8 sps:$4 sm:$0xff]   ;;  %v2055_v18 = vld [vmem:[#allocation8 + $0x74] ss:$8 sps:$4 sm:$0xff]  }
 0x1ca   :  { %875 = vmatprep.mubr.bf16.mxu0 %v456_v19  ;;  %v2053_v19 = vld [vmem:[#allocation8 + $0x70] ss:$8 sps:$4 sm:$0xff]  }
 0x1cb   :  { %876 = vmatmul.mubr.bf16.vlgmr.msra.gmra.mrb[4].mxu0 %v455_v21  ;;  %v2056_v21 = vld [vmem:[#allocation8 + $0x80] ss:$8 sps:$4 sm:$0xff]  }
 0x1cc   :  { %885 = vmatpush1.bf16.msra.mxu0 %v1936_v20  ;;  %916 = vmatprep.mubr.bf16.mxu0 %v458_v23  ;;  %v2058_v20 = vld [vmem:[#allocation8 + $0x84] ss:$8 sps:$4 sm:$0xff]   ;;  %v2059_v23 = vld [vmem:[#allocation8 + $0x90] ss:$8 sps:$4 sm:$0xff]  }
 0x1cd   :  { %886 = vmatprep.subr.bf16.mxu0 %v1941_v22  ;;  %v2061_v22 = vld [vmem:[#allocation8 + $0x94] ss:$8 sps:$4 sm:$0xff]  }
 0x1d0   :  { %887 = vmatpush1.bf16.msra.mxu0 %v1939_v24  ;;  %v2064_v24 = vld [vmem:[#allocation8 + $0xa4] ss:$8 sps:$4 sm:$0xff]  }
 0x1d1   :  { %888 = vmatprep.subr.bf16.mxu0 %v1944_v25  ;;  %v2062_v25 = vld [vmem:[#allocation8 + $0xa0] ss:$8 sps:$4 sm:$0xff]  }
 0x1d4   :  { %889 = vmatpush1.bf16.msra.mxu0 %v1942_v26  ;;  %v2067_v26 = vld [vmem:[#allocation8 + $0xb4] ss:$8 sps:$4 sm:$0xff]  }
 0x1d5   :  { %890 = vmatprep.subr.bf16.mxu0 %v1947_v27  ;;  %v2065_v27 = vld [vmem:[#allocation8 + $0xb0] ss:$8 sps:$4 sm:$0xff]  }
 0x1d8   :  { %891 = vmatpush1.bf16.msra.mxu0 %v1945_v28  ;;  %v2070_v28 = vld [vmem:[#allocation8 + $0xc4] ss:$8 sps:$4 sm:$0xff]  }
 0x1d9   :  { %892 = vmatprep.subr.bf16.mxu0 %v1950_v29  ;;  %v2068_v29 = vld [vmem:[#allocation8 + $0xc0] ss:$8 sps:$4 sm:$0xff]  }
 0x1dc   :  { %893 = vmatpush1.bf16.msra.mxu0 %v1948_v30  ;;  %v2073_v30 = vld [vmem:[#allocation8 + $0xd4] ss:$8 sps:$4 sm:$0xff]  }
 0x1dd   :  { %894 = vmatprep.subr.bf16.mxu0 %v1953_v31  ;;  %v2071_v31 = vld [vmem:[#allocation8 + $0xd0] ss:$8 sps:$4 sm:$0xff]  }
 0x1e0   :  { %895 = vmatpush1.bf16.msra.mxu0 %v1951_v32  ;;  %v2076_v32 = vld [vmem:[#allocation8 + $0xe4] ss:$8 sps:$4 sm:$0xff]  }
 0x1e1   :  { %896 = vmatprep.subr.bf16.mxu0 %v1956_v33  ;;  %v2074_v33 = vld [vmem:[#allocation8 + $0xe0] ss:$8 sps:$4 sm:$0xff]  }
 0x1e4   :  { %897 = vmatpush1.bf16.msra.mxu0 %v1954_v34  ;;  %v2079_v34 = vld [vmem:[#allocation8 + $0xf4] ss:$8 sps:$4 sm:$0xff]  }
 0x1e5   :  { %898 = vmatprep.subr.bf16.mxu0 %v1959_v35  ;;  %v2077_v35 = vld [vmem:[#allocation8 + $0xf0] ss:$8 sps:$4 sm:$0xff]  }
 0x1e8   :  { %899 = vmatpush1.bf16.msra.mxu0 %v1957_v36  ;;  %v2080_v36 = vld [vmem:[%s2485_s10 + $0x40] sm:$0xff]  }
 0x1e9   :  { %900 = vmatprep.subr.bf16.mxu0 %v1962_v37  ;;  %v2081_v37 = vld [vmem:[%s2485_s10] sm:$0xff]  }
 0x1ec   :  { %901 = vmatpush1.bf16.msra.mxu0 %v1960_v38  ;;  %v2082_v38 = vld [vmem:[%s2485_s10 + $0x48] sm:$0xff]  }
 0x1ed   :  { %902 = vmatprep.subr.bf16.mxu0 %v1965_v39  ;;  %v2083_v39 = vld [vmem:[%s2485_s10 + $0x8] sm:$0xff]  }
 0x1f0   :  { %903 = vmatpush1.bf16.msra.mxu0 %v1963_v40  ;;  %v2084_v40 = vld [vmem:[%s2485_s10 + $0x50] sm:$0xff]  }
 0x1f1   :  { %904 = vmatprep.subr.bf16.mxu0 %v1968_v41  ;;  %v2085_v41 = vld [vmem:[%s2485_s10 + $0x10] sm:$0xff]  }
 0x1f4   :  { %905 = vmatpush1.bf16.msra.mxu0 %v1966_v42  ;;  %v2086_v42 = vld [vmem:[%s2485_s10 + $0x58] sm:$0xff]  }
 0x1f5   :  { %906 = vmatprep.subr.bf16.mxu0 %v1971_v43  ;;  %v2087_v43 = vld [vmem:[%s2485_s10 + $0x18] sm:$0xff]  }
 0x1f8   :  { %907 = vmatpush1.bf16.msra.mxu0 %v1969_v44  ;;  %v2088_v44 = vld [vmem:[%s2485_s10 + $0x60] sm:$0xff]  }
 0x1f9   :  { %908 = vmatprep.subr.bf16.mxu0 %v1974_v45  ;;  %v2089_v45 = vld [vmem:[%s2485_s10 + $0x20] sm:$0xff]  }
 0x1fc   :  { %909 = vmatpush1.bf16.msra.mxu0 %v1972_v46  ;;  %v2090_v46 = vld [vmem:[%s2485_s10 + $0x68] sm:$0xff]  }
 0x1fd   :  { %910 = vmatprep.subr.bf16.mxu0 %v1977_v48  ;;  %v959_v48 = vld [vmem:[%s2482_s7] sm:$0x3] }
 0x1fe   :  { %v968_v50 = vrot.slane %v959_v48, %v2382_v61 }
 0x200   :  { %911 = vmatpush1.bf16.msra.mxu0 %v1975_v49  ;;  %v964_v49 = vrot.slane %v959_v48, %v2374_v58 }
 0x201   :  { %912 = vmatprep.subr.bf16.mxu0 %v1980_v51 }
 0x204   :  { %913 = vmatpush1.bf16.msra.mxu0 %v1978_v52 }
 0x205   :  { %914 = vmatprep.subr.bf16.mxu0 %v1983_v54 }
 0x208   :  { %915 = vmatpush1.bf16.msra.mxu0 %v1981_v56 }
 0x209   :  { %1796 = vmatprep.subr.bf16.mxu0 %v2080_v36 }
 0x20b   :  { %917 = vmatmul.mubr.bf16.vlgmr.msra.gmra.mrb[4].mxu0 %v457_v55 }
 0x20c   :  { %1797 = vmatpush3.bf16.msra.mxu0 %v2081_v37 }
 0x20d   :  { %1798 = vmatprep.subr.bf16.mxu0 %v2082_v38 }
 0x210   :  { %1799 = vmatpush3.bf16.msra.mxu0 %v2083_v39 }
 0x211   :  { %1800 = vmatprep.subr.bf16.mxu0 %v2084_v40 }
 0x214   :  { %1801 = vmatpush3.bf16.msra.mxu0 %v2085_v41 }
 0x215   :  { %1802 = vmatprep.subr.bf16.mxu0 %v2086_v42 }
 0x218   :  { %1803 = vmatpush3.bf16.msra.mxu0 %v2087_v43 }
 0x219   :  { %1804 = vmatprep.subr.bf16.mxu0 %v2088_v44 }
 0x21c   :  { %1805 = vmatpush3.bf16.msra.mxu0 %v2089_v45 }
 0x21d   :  { %1806 = vmatprep.subr.bf16.mxu0 %v2090_v46 }
 0x220   :  { %1807 = vmatpush3.bf16.msra.mxu0 %v2091_v47 }
 0x2de   :  { %v2395_v63 = vpop.f32.mrb[4].mxu0 }
 0x2df   :  { %v2397_v0 = vpop.f32.mrb[5].mxu0  ;;  %v925_v4 = vpack.c.bf16 %v2395_v63, %v2395_v63 }
 0x2e0   :  { %v926_v1 = vpack.c.bf16 %v2397_v0, %v2397_v0  ;;  %v922_v2 = vpop.f32.mrb[6].mxu0 }
 0x2e1   :  { %v923_v5 = vpop.f32.mrb[7].mxu0 }
 0x2e2   :  { %1163 = vmatprep.mubr.bf16.mxu1 %v926_v1  ;;  %v1210_v5 = vld [vmem:[%s2484_s9] sm:$0x3] }
 0x2e3   :  { %1164 = vmatmul.mubr.bf16.vlgmr.msra.gmra.mrb[4].mxu1 %v925_v4  ;;  %v2093_v4 = vld [vmem:[%s2485_s10 + $0x30] sm:$0xff]  }
 0x2e4   :  { %1383 = vmatpush1.bf16.msra.mxu1 %v2032_v3  ;;  %v2092_v3 = vld [vmem:[%s2485_s10 + $0x70] sm:$0xff]  }
 0x2e5   :  { %1384 = vmatprep.subr.bf16.mxu1 %v2037_v6  ;;  %1808 = vmatprep.subr.bf16.mxu0 %v2092_v3  ;;  %v1215_v6 = vrot.slane %v1210_v5, %v2374_v58 }
 0x2e6   :  { %1809 = vmatpush3.bf16.msra.mxu0 %v2093_v4 }
 0x2e8   :  { %1385 = vmatpush1.bf16.msra.mxu1 %v2035_v7  ;;  %v1219_v7 = vrot.slane %v1210_v5, %v2382_v61 }
 0x2e9   :  { %1386 = vmatprep.subr.bf16.mxu1 %v2040_v8 }
 0x2ec   :  { %1387 = vmatpush1.bf16.msra.mxu1 %v2038_v9 }
 0x2ed   :  { %1388 = vmatprep.subr.bf16.mxu1 %v2043_v10 }
 0x2f0   :  { %1389 = vmatpush1.bf16.msra.mxu1 %v2041_v11 }
 0x2f1   :  { %1390 = vmatprep.subr.bf16.mxu1 %v2046_v12 }
 0x2f4   :  { %1391 = vmatpush1.bf16.msra.mxu1 %v2044_v13 }
 0x2f5   :  { %1392 = vmatprep.subr.bf16.mxu1 %v2049_v14 }
 0x2f8   :  { %1393 = vmatpush1.bf16.msra.mxu1 %v2047_v15 }
 0x2f9   :  { %1394 = vmatprep.subr.bf16.mxu1 %v2052_v16 }
 0x2fc   :  { %1395 = vmatpush1.bf16.msra.mxu1 %v2050_v17 }
 0x2fd   :  { %1396 = vmatprep.subr.bf16.mxu1 %v2055_v18 }
 0x300   :  { %1397 = vmatpush1.bf16.msra.mxu1 %v2053_v19 }
 0x301   :  { %1398 = vmatprep.subr.bf16.mxu1 %v2058_v20 }
 0x304   :  { %1399 = vmatpush1.bf16.msra.mxu1 %v2056_v21 }
 0x305   :  { %1400 = vmatprep.subr.bf16.mxu1 %v2061_v22 }
 0x308   :  { %1401 = vmatpush1.bf16.msra.mxu1 %v2059_v23 }
 0x309   :  { %1402 = vmatprep.subr.bf16.mxu1 %v2064_v24 }
 0x30c   :  { %1403 = vmatpush1.bf16.msra.mxu1 %v2062_v25 }
 0x30d   :  { %1404 = vmatprep.subr.bf16.mxu1 %v2067_v26 }
 0x310   :  { %1405 = vmatpush1.bf16.msra.mxu1 %v2065_v27 }
 0x311   :  { %1406 = vmatprep.subr.bf16.mxu1 %v2070_v28 }
 0x314   :  { %1407 = vmatpush1.bf16.msra.mxu1 %v2068_v29 }
 0x315   :  { %1408 = vmatprep.subr.bf16.mxu1 %v2073_v30 }
 0x318   :  { %1409 = vmatpush1.bf16.msra.mxu1 %v2071_v31 }
 0x319   :  { %1410 = vmatprep.subr.bf16.mxu1 %v2076_v32 }
 0x31c   :  { %1411 = vmatpush1.bf16.msra.mxu1 %v2074_v33 }
 0x31d   :  { %1412 = vmatprep.subr.bf16.mxu1 %v2079_v34 }
 0x320   :  { %1413 = vmatpush1.bf16.msra.mxu1 %v2077_v35 }
 0x3b6   :  { %v1165_v51 = vpop.f32.mrb[4].mxu1 }
 0x3b7   :  { %v1166_v52 = vadd.f32 %v1165_v51, %v964_v49  ;;  %v1167_v53 = vpop.f32.mrb[5].mxu1 }
 0x3b8   :  { %v1168_v54 = vadd.f32 %v1167_v53, %v968_v50  ;;  %v1169_v56 = vpop.f32.mrb[6].mxu1 }
 0x3b9   :  { %v1172_v57 = vmax.f32 %v1166_v52, 0.0  ;;  %v1170_v55 = vpop.f32.mrb[7].mxu1 }
 0x3ba   :  { %v1173_v59 = vmax.f32 %v1168_v54, 0.0 }
 0x3bb   :  { %v1174_v62 = vadd.f32 %v1172_v57, %v2395_v63  ;;  %v2094_v63 = vld [vmem:[%s2485_s10 + $0x78] sm:$0xff]  }
 0x3bc   :  { %v1175_v60 = vadd.f32 %v1173_v59, %v2397_v0  ;;  %v2095_v0 = vld [vmem:[%s2485_s10 + $0x38] sm:$0xff]   ;;  %1810 = vmatprep.subr.bf16.mxu0 %v2094_v63  ;;  %s2228_s10 = smov [#allocation10]  }
 0x3bd   :  { %v1176_v2 = vpack.c.bf16 %v1174_v62, %v1174_v62  ;;  %1811 = vmatpush3.bf16.msra.mxu0 %v2095_v0  ;;  %s1603_s25 = sshll.u32 %s2228_s10, 4  ;;  %s1604_s25 = int_to_ptr.vmem [resolvable:$true] %s1603_s25 }
 0x3be   :  { %v1177_v1 = vpack.c.bf16 %v1175_v60, %v1175_v60  ;;  %s2186_s9 = scalar_lea.vmem %s1604_s25, 128  ;;  %p2191_p5 = scmp.lt.s32.totalorder %s1604_s25, %s1604_s25 }
 0x3bf   :  { %p2187_p4 = scmp.ne.s32.totalorder %s1604_s25, %s2186_s9  ;;  %p2192_p6 = scmp.lt.s32.totalorder %s2186_s9, %s2186_s9 }
 0x3c0   :  { %1414 = vmatprep.mubr.bf16.mxu1 %v1177_v1 }
 0x3c1   :  { %1415 = vmatmul.mubr.bf16.vlgmr.msra.gmra.mrb[8].mxu1 %v1176_v2  ;;  %p2193_p7 = por %p2192_p6, %p2191_p5 }
 0x3c3   :  { %p2194_p8 = pnand %p2193_p7, %p2187_p4 }
 0x494   :  { %v1416_v8 = vpop.f32.mrb[8].mxu1 }
 0x495   :  { %v1417_v9 = vadd.f32 %v1416_v8, %v1215_v6  ;;  %v1418_v10 = vpop.f32.mrb[9].mxu1 }
 0x496   :  { %v1419_v11 = vadd.f32 %v1418_v10, %v1219_v7  ;;  %v1420_v12 = vpop.f32.mrb[10].mxu1 }
 0x497   :  { %v1423_v13 = vmax.f32 %v1417_v9, 0.0  ;;  %v1421_v14 = vpop.f32.mrb[11].mxu1 }
 0x498   :  { %v1424_v15 = vmax.f32 %v1419_v11, 0.0 }
 0x499   :  { %v1425_v17 = vpack.c.bf16 %v1423_v13, %v1423_v13 }
 0x49a   :  { %v1426_v16 = vpack.c.bf16 %v1424_v15, %v1424_v15 }
 0x49c   :  { %1587 = vmatprep.mubr.bf16.mxu0 %v1426_v16 }
 0x49d   :  { %1588 = vmatmul.mubr.bf16.vlgmr.msra.gmra.mrb[8].mxu0 %v1425_v17 }
 0x570   :  { %v1812_v18 = vpop.f32.mrb[8].mxu0 }
 0x571   :  { %v1813_v19 = vpop.f32.mrb[9].mxu0 }
 0x572   :  { %v1814_v58 = vadd.f32 %v1813_v19, %v1812_v18  ;;  %v1815_v20 = vpop.f32.mrb[10].mxu0 }
 0x573   :  { %v1816_v61 = vpop.f32.mrb[11].mxu0 }
 0x574   :  { %1596 = vst.msk [vmem:[#allocation10] sm:$0xff] %vm1595_vm0, %v1814_v58 }
 0x575   :  { %2197 = shalt.err (!%p2194_p8)
}
 0x576   :  { %s2198_s6 = scalar_lea.hbm %s2486_s11, 128 }
 0x577   :  { %p2199_p9 = scmp.ne.s32.totalorder %s2486_s11, %s2198_s6  ;;  %p2202_p10 = scmp.lt.u32.totalorder %s2198_s6, %s2486_s11 }
 0x579   :  { %p2204_p11 = pnand %p2202_p10, %p2199_p9 }
 0x57b   :  { %2207 = shalt.err (!%p2204_p11)
}
 0x57c   :  { %1606 = dma.vmem_to_hbm [thread:$0]  %s1604_s25, 128, %s2486_s11, [#allocation4]  }
 0x57d   :  { %2214 = dma.done.wait [#allocation4], 128  }
 0x57e   :  { %2215 = vsyncadd [#allocation4], 4294967168 }
 0x57f   :  { %1610 = vsyncpa [#allocation3], 1 }
 0x580   :  { %1611 = vsyncpa [#allocation6], 1 }
 0x581   :  { %1612 = vsyncpa [#allocation9], 1 }
 0x582   :  { %1613 = vsyncpa [#allocation4], 1 }

</bundles_post_ra>
